<compile_context>
chip_gen: v6e
topology: v6e:2x2x1
jax: 0.10.0
libtpu: 0.0.40
codegen_flags: <defaults>
</compile_context>

<pallas_src>
import functools

import jax
import jax.numpy as jnp
from jax.experimental import pallas as pl
from jax.experimental.pallas import tpu as pltpu

ALPHA = 1.0
GAMMA = 2.0          # statically exploited as a square below
REDUCTION = "mean"   # matches FocalLoss(reduction='mean')

_NEG_INF = -1e30     # class-axis padding value


def _round_up(x, m):
    return (x + m - 1) // m * m


def _focal_loss_kernel(logits_ref, targets_ref, out_ref, *, inv_n):
    pid = pl.program_id(0)

    @pl.when(pid == 0)
    def _init():
        out_ref[...] = jnp.zeros_like(out_ref)

    # cast is a no-op for f32 inputs; required if bf16 logits are ever fed (v5e
    # has no bf16 VPU/EUP).
    x = logits_ref[...].astype(jnp.float32)   # (TILE_N, C_pad)
    t = targets_ref[...]                       # (TILE_N, 1) int32; padded rows carry -1

    # numerically stable softmax pieces over the class (lane) axis
    m = jnp.max(x, axis=1, keepdims=True)            # (TILE_N, 1)
    ex = jnp.exp(x - m)                               # pad columns (-1e30) -> exp == 0
    se = jnp.sum(ex, axis=1, keepdims=True)           # (TILE_N, 1)

    # gather the target-class logit with a one-hot (no dynamic gather on TPU)
    iota = jax.lax.broadcasted_iota(jnp.int32, x.shape, 1)
    onehot = (iota == t).astype(x.dtype)               # all-zero for padded rows (t == -1)
    x_t = jnp.sum(x * onehot, axis=1, keepdims=True)   # (TILE_N, 1)

    z = x_t - m
    ce = jnp.log(se) - z                               # per-row cross entropy
    pt = jnp.exp(z) * pl.reciprocal(se, approx=True)   # == exp(-ce), no log->exp round trip
    w = jnp.maximum(1.0 - pt, 0.0)                     # clamp rounding-induced pt > 1
    focal = (ALPHA * ce) * (w * w)                     # gamma == 2 -> square, no float pow

    valid = (t >= 0).astype(jnp.float32)               # mask padded rows
    out_ref[...] += jnp.sum(focal * valid)

    @pl.when(pid == pl.num_programs(0) - 1)
    def _finalize():
        out_ref[...] = out_ref[...] * jnp.float32(inv_n)   # mean over the real rows


def focal_loss(logits, targets):
    """logits: (N, C) float, targets: (N,) int -> scalar float32 (mean focal loss)."""
    n, c = logits.shape
    targets = targets.astype(jnp.int32).reshape(n, 1)

    # Lane-dense class axis: pad C up to a multiple of 128 with a very negative value.
    c_pad = _round_up(max(c, 128), 128)

    # Row tile: multiple of 8, capped so one logits tile is <= ~2 MiB. Two inputs x
    # 2 double-buffers stays far below even v7x's scoped VMEM budget while still
    # being large enough (up to 512 rows) to sit near the HBM roofline.
    bytes_per_row = 4 * c_pad
    tile_n = max(8, min(512, (2 * 1024 * 1024) // bytes_per_row // 8 * 8))
    tile_n = min(tile_n, _round_up(n, 8))              # don't over-pad tiny batches
    n_pad = _round_up(n, tile_n)
    num_tiles = n_pad // tile_n

    x = logits
    if c_pad != c:
        x = jnp.pad(x, ((0, 0), (0, c_pad - c)), constant_values=_NEG_INF)
    if n_pad != n:
        x = jnp.pad(x, ((0, n_pad - n), (0, 0)), constant_values=0.0)
        targets = jnp.pad(targets, ((0, n_pad - n), (0, 0)), constant_values=-1)

    kernel = functools.partial(_focal_loss_kernel, inv_n=1.0 / n)

    out = pl.pallas_call(
        kernel,
        out_shape=jax.ShapeDtypeStruct((1, 1), jnp.float32),
        grid_spec=pltpu.PrefetchScalarGridSpec(
            num_scalar_prefetch=0,
            grid=(num_tiles,),
            in_specs=[
                pl.BlockSpec((tile_n, c_pad), lambda i: (i, 0)),   # logits row tile
                pl.BlockSpec((tile_n, 1), lambda i: (i, 0)),       # targets row tile
            ],
            out_specs=pl.BlockSpec((1, 1), lambda i: (0, 0)),      # resident accumulator
        ),
        compiler_params=pltpu.CompilerParams(
            dimension_semantics=("arbitrary",),        # accumulating reduction axis
            vmem_limit_bytes=32 * 1024 * 1024,         # headroom; safe on v5e/v6e/v7x
        ),
        cost_estimate=pl.CostEstimate(
            flops=6 * n_pad * c_pad,
            transcendentals=n_pad * c_pad,
            bytes_accessed=4 * n_pad * c_pad + 4 * n_pad + 4,
        ),
    )(x, targets)
    # NOTE: for vocab-scale C (>= ~8K) a second, streamed grid axis over classes
    # (online running max / sum-exp) would keep the working set fixed; not needed
    # for the class counts this module targets.
    return out[0, 0]


if __name__ == "__main__":
    key = jax.random.PRNGKey(0)
    k1, k2, k3, k4 = jax.random.split(key, 4)

    def reference(logits, targets):
        logp = jax.nn.log_softmax(logits.astype(jnp.float32), axis=-1)
        ce = -jnp.take_along_axis(logp, targets[:, None], axis=-1)[:, 0]
        pt = jnp.exp(-ce)
        return jnp.mean(ALPHA * (1.0 - pt) ** GAMMA * ce)

    # Small demo shape (single tile; class axis padded 32 -> 128).
    N, C = 8, 32
    logits = jax.random.normal(k1, (N, C), dtype=jnp.float32)
    targets = jax.random.randint(k2, (N,), 0, C, dtype=jnp.int32)
    loss = focal_loss(logits, targets)
    jax.block_until_ready(loss)
    ref = reference(logits, targets)
    assert jnp.allclose(loss, ref, rtol=1e-3, atol=1e-5), (loss, ref)

    # Ragged shape exercising class padding (1000 -> 1024), row padding and
    # multi-tile accumulation (grid of 3).
    N2, C2 = 1040, 1000
    logits2 = jax.random.normal(k3, (N2, C2), dtype=jnp.float32)
    targets2 = jax.random.randint(k4, (N2,), 0, C2, dtype=jnp.int32)
    loss2 = focal_loss(logits2, targets2)
    jax.block_until_ready(loss2)
    ref2 = reference(logits2, targets2)
    assert jnp.allclose(loss2, ref2, rtol=1e-3, atol=1e-5), (loss2, ref2)

    print("KERNEL_OK")
</pallas_src>

<mosaic_0001>
module attributes {stable_mosaic.version = 11 : i64} {
  func.func @_focal_loss_kernel(%arg0: i32, %arg1: memref<8x128xf32, #tpu.memory_space<vmem>>, %arg2: memref<8x1xi32, #tpu.memory_space<vmem>>, %arg3: memref<1x1xf32, #tpu.memory_space<vmem>>) attributes {dimension_semantics = [#tpu.dimension_semantics<arbitrary>], iteration_bounds = array<i64: 1>, scalar_prefetch = 0 : i64, scratch_operands = 0 : i64, tpu.core_type = #tpu.core_type<tc>, window_params = [{transform_indices = @transform_0, window_bounds = array<i64: 8, 128>}, {transform_indices = @transform_1, window_bounds = array<i64: 8, 1>}, {pipeline_mode = #tpu.pipeline_mode<synchronous>, transform_indices = @transform_2, window_bounds = array<i64: 1, 1>}]} {
    %c0_i32 = arith.constant 0 : i32
    %0 = arith.cmpi eq, %arg0, %c0_i32 : i32
    %1 = arith.extui %0 : i1 to i32
    %c0_i32_0 = arith.constant 0 : i32
    %2 = arith.cmpi ne, %1, %c0_i32_0 : i32
    scf.if %2 {
      %cst_17 = arith.constant 0.000000e+00 : f32
      %50 = vector.broadcast %cst_17 : f32 to vector<1x1xf32>
      %c0_18 = arith.constant 0 : index
      %c0_19 = arith.constant 0 : index
      %51 = vector.load %arg3[%c0_18, %c0_19] : memref<1x1xf32, #tpu.memory_space<vmem>>, vector<1x1xf32>
      tpu.vector_store %arg3[%c0_18, %c0_19], %50 {strides = array<i32>} : memref<1x1xf32, #tpu.memory_space<vmem>>, vector<1x1xf32>,
    } else {
    }
    %c0 = arith.constant 0 : index
    %c0_1 = arith.constant 0 : index
    %3 = vector.load %arg1[%c0, %c0_1] : memref<8x128xf32, #tpu.memory_space<vmem>>, vector<8x128xf32>
    %c0_2 = arith.constant 0 : index
    %c0_3 = arith.constant 0 : index
    %4 = vector.load %arg2[%c0_2, %c0_3] : memref<8x1xi32, #tpu.memory_space<vmem>>, vector<8x1xi32>
    %cst = arith.constant dense<0xFF800000> : vector<8xf32>
    %5 = vector.multi_reduction <maximumf>, %3, %cst [1] : vector<8x128xf32> to vector<8xf32>
    %6 = vector.shape_cast %5 : vector<8xf32> to vector<8x1xf32>
    %7 = vector.broadcast %6 : vector<8x1xf32> to vector<8x128xf32>
    %8 = arith.subf %3, %7 : vector<8x128xf32>
    %9 = math.exp %8 : vector<8x128xf32>
    %cst_4 = arith.constant dense<0.000000e+00> : vector<8xf32>
    %10 = vector.multi_reduction <add>, %9, %cst_4 [1] : vector<8x128xf32> to vector<8xf32>
    %11 = vector.shape_cast %10 : vector<8xf32> to vector<8x1xf32>
    %12 = tpu.iota {dimensions = array<i32: 1>} : vector<8x128xi32>
    %13 = vector.broadcast %4 : vector<8x1xi32> to vector<8x128xi32>
    %14 = arith.cmpi eq, %12, %13 : vector<8x128xi32>
    %15 = arith.extui %14 : vector<8x128xi1> to vector<8x128xi32>
    %16 = arith.sitofp %15 : vector<8x128xi32> to vector<8x128xf32>
    %17 = arith.mulf %3, %16 : vector<8x128xf32>
    %cst_5 = arith.constant dense<0.000000e+00> : vector<8xf32>
    %18 = vector.multi_reduction <add>, %17, %cst_5 [1] : vector<8x128xf32> to vector<8xf32>
    %19 = vector.shape_cast %18 : vector<8xf32> to vector<8x1xf32>
    %20 = arith.subf %19, %6 : vector<8x1xf32>
    %21 = math.log %11 : vector<8x1xf32>
    %22 = arith.subf %21, %20 : vector<8x1xf32>
    %23 = math.exp %20 : vector<8x1xf32>
    %24 = tpu.reciprocal %11 {approx = true} : vector<8x1xf32> -> vector<8x1xf32>
    %25 = arith.mulf %23, %24 : vector<8x1xf32>
    %cst_6 = arith.constant 1.000000e+00 : f32
    %26 = vector.broadcast %cst_6 : f32 to vector<8x1xf32>
    %27 = arith.subf %26, %25 : vector<8x1xf32>
    %cst_7 = arith.constant 0.000000e+00 : f32
    %28 = vector.broadcast %cst_7 : f32 to vector<8x1xf32>
    %29 = arith.maximumf %27, %28 : vector<8x1xf32>
    %cst_8 = arith.constant 1.000000e+00 : f32
    %30 = vector.broadcast %cst_8 : f32 to vector<8x1xf32>
    %31 = arith.mulf %30, %22 : vector<8x1xf32>
    %32 = arith.mulf %29, %29 : vector<8x1xf32>
    %33 = arith.mulf %31, %32 : vector<8x1xf32>
    %c0_i32_9 = arith.constant 0 : i32
    %34 = vector.broadcast %c0_i32_9 : i32 to vector<8x1xi32>
    %35 = arith.cmpi sge, %4, %34 : vector<8x1xi32>
    %36 = arith.extui %35 : vector<8x1xi1> to vector<8x1xi32>
    %37 = arith.sitofp %36 : vector<8x1xi32> to vector<8x1xf32>
    %c0_10 = arith.constant 0 : index
    %c0_11 = arith.constant 0 : index
    %38 = vector.load %arg3[%c0_10, %c0_11] : memref<1x1xf32, #tpu.memory_space<vmem>>, vector<1x1xf32>
    %39 = arith.mulf %33, %37 : vector<8x1xf32>
    %40 = vector.shape_cast %39 : vector<8x1xf32> to vector<1x8x1xf32>
    %cst_12 = arith.constant dense<0.000000e+00> : vector<1xf32>
    %41 = vector.multi_reduction <add>, %40, %cst_12 [1, 2] : vector<1x8x1xf32> to vector<1xf32>
    %42 = vector.shape_cast %41 : vector<1xf32> to vector<1x1x1xf32>
    %43 = vector.extract %42[0, 0, 0] : f32 from vector<1x1x1xf32>
    %44 = vector.broadcast %43 : f32 to vector<1x1xf32>
    %45 = arith.addf %38, %44 : vector<1x1xf32>
    %c0_13 = arith.constant 0 : index
    %c0_14 = arith.constant 0 : index
    %46 = vector.load %arg3[%c0_13, %c0_14] : memref<1x1xf32, #tpu.memory_space<vmem>>, vector<1x1xf32>
    tpu.vector_store %arg3[%c0_13, %c0_14], %45 {strides = array<i32>} : memref<1x1xf32, #tpu.memory_space<vmem>>, vector<1x1xf32>,
    %c0_i32_15 = arith.constant 0 : i32
    %47 = arith.cmpi eq, %arg0, %c0_i32_15 : i32
    %48 = arith.extui %47 : i1 to i32
    %c0_i32_16 = arith.constant 0 : i32
    %49 = arith.cmpi ne, %48, %c0_i32_16 : i32
    scf.if %49 {
      %c0_17 = arith.constant 0 : index
      %c0_18 = arith.constant 0 : index
      %50 = vector.load %arg3[%c0_17, %c0_18] : memref<1x1xf32, #tpu.memory_space<vmem>>, vector<1x1xf32>
      %cst_19 = arith.constant 1.250000e-01 : f32
      %51 = vector.broadcast %cst_19 : f32 to vector<1x1xf32>
      %52 = arith.mulf %50, %51 : vector<1x1xf32>
      %c0_20 = arith.constant 0 : index
      %c0_21 = arith.constant 0 : index
      %53 = vector.load %arg3[%c0_20, %c0_21] : memref<1x1xf32, #tpu.memory_space<vmem>>, vector<1x1xf32>
      tpu.vector_store %arg3[%c0_20, %c0_21], %52 {strides = array<i32>} : memref<1x1xf32, #tpu.memory_space<vmem>>, vector<1x1xf32>,
    } else {
    }
    return
  }
  func.func @transform_0(%arg0: i32) -> (i32, i32) {
    %c0_i32 = arith.constant 0 : i32
    %c0_i32_0 = arith.constant 0 : i32
    return %arg0, %c0_i32 : i32, i32
  }
  func.func @transform_1(%arg0: i32) -> (i32, i32) {
    %c0_i32 = arith.constant 0 : i32
    %c0_i32_0 = arith.constant 0 : i32
    return %arg0, %c0_i32 : i32, i32
  }
  func.func @transform_2(%arg0: i32) -> (i32, i32) {
    %c0_i32 = arith.constant 0 : i32
    %c0_i32_0 = arith.constant 0 : i32
    %c0_i32_1 = arith.constant 0 : i32
    return %c0_i32, %c0_i32_0 : i32, i32
  }
}

</mosaic_0001>

<bundles_post_ra>
// kernel: tpu_custom_call.1
= control target key start
LH: loop header
LB: loop body
LE: loop exit
PB: predicated region body
PF: predicated region fallthrough
CT: control target
= control target key end

     0   :  { %s158_s0 = inlined_call_operand.vmem [shape: f32[8,128], index: 0, kind: input, shape index: {}]   ;;  %s159_s1 = inlined_call_operand.vmem [shape: s32[8,1], index: 1, kind: input, shape index: {}]   ;;  %s160_s2 = inlined_call_operand.hbm [shape: f32[1,1], index: 2, kind: output, shape index: {}]  }
   0x1   :  { %v18_v0 = vld [vmem:[%s158_s0] sm:$0xff] }
   0x2   :  { %7 = vsyncpa [#allocation3], 0  ;;  %20 = vmax.xlane.f32.xlu0 %v18_v0  ;;  %v128_v1 = vmov 0   ;;  %v19_v2 = vld [vmem:[%s159_s1] sm:$0xff]  ;;  %vm16_vm0 = vcmask 0   ;;  %v129_v3 = vmov 0.0   ;;  %v27_v6 = vlaneseq }
   0x3   :  { %97 = vset.pattern.permute.xlu0 %v128_v1  ;;  %17 = vst.msk [vmem:[#allocation2] sm:$0x1] %vm16_vm0, %v129_v3  ;;  %vm50_vm2 = vcmp.ge.s32.totalorder %v19_v2, 0  ;;  %vm55_vm3 = vcmask 7168   ;;  %s130_s1 = smov [#allocation2]  }
   0x4   :  { %v28_v8 = vand.u32 127, %v27_v6  ;;  %v91_v26 = vsel %vm50_vm2, 1.0, %v129_v3  ;;  %s82_s13 = sshll.u32 %s130_s1, 4  ;;  %s83_s13 = int_to_ptr.vmem [resolvable:$true] %s82_s13 }
   0x5   :  { %s106_s14 = scalar_lea.vmem %s83_s13, 16  ;;  %s110_s15 = scalar_lea.vmem %s83_s13, 32 }
   0x6   :  { %p107_p0 = scmp.ne.s32.totalorder %s83_s13, %s106_s14  ;;  %p111_p1 = scmp.lt.s32.totalorder %s83_s13, %s83_s13 }
   0x7   :  { %p112_p2 = scmp.lt.s32.totalorder %s110_s15, %s106_s14 }
   0x9   :  { %p113_p3 = por %p112_p2, %p111_p1 }
   0xa   :  { %v53_v37 = vld [vmem:[#allocation2] sm:$0x1] }
   0xb   :  { %p114_p4 = pnand %p113_p3, %p107_p0 }
  0x18   :  { %30 = vperm.xlu0 %97, %v19_v2  }
  0x8b   :  { %v21_v4 = vpop.xlane.xlu0 %20 }
  0x8c   :  { %v22_v5 = vsub.f32 %v18_v0, %v21_v4 }
  0x8e   :  { %v23_v7 = vmul.f32 1.442695, %v22_v5 }
  0x90   :  { %98 = vpow2.f32 %v23_v7 }
  0x93   :  { %v31_v9 = vpop.permute.xlu0 %30 }
  0x94   :  { %vm32_vm1 = vcmp.eq.s32.totalorder %v28_v8, %v31_v9 }
  0x95   :  { %v90_v10 = vsel %vm32_vm1, 1.0, %v129_v3 }
  0x96   :  { %v35_v11 = vmul.f32 %v90_v10, %v18_v0 }
  0x98   :  { %36 = vadd.xlane.f32.xlu1 %v35_v11 }
  0x9d   :  { %v99_v12 = vpop.eup %98 }
  0x9e   :  { %25 = vadd.xlane.f32.xlu1 %v99_v12 }
 0x121   :  { %v37_v13 = vpop.xlane.xlu1 %36 }
 0x122   :  { %v38_v14 = vsub.f32 %v37_v13, %v21_v4 }
 0x124   :  { %v42_v15 = vmul.f32 1.442695, %v38_v14 }
 0x126   :  { %100 = vpow2.f32 %v42_v15 }
 0x127   :  { %v26_v16 = vpop.xlane.xlu1 %25 }
 0x128   :  { %102 = vlog2.f32 %v26_v16 }
 0x129   :  { %104 = vrcp.f32 %v26_v16 }
 0x133   :  { %v101_v17 = vpop.eup %100 }
 0x135   :  { %v103_v18 = vpop.eup %102 }
 0x136   :  { %v105_v19 = vpop.eup %104  ;;  %v40_v21 = vmul.f32 0.6931472, %v103_v18 }
 0x137   :  { %v45_v20 = vmul.f32 %v105_v19, %v101_v17 }
 0x138   :  { %v41_v24 = vsub.f32 %v40_v21, %v38_v14 }
 0x139   :  { %v46_v22 = vsub.f32 1.0, %v45_v20 }
 0x13b   :  { %v47_v23 = vmax.f32 %v46_v22, 0.0 }
 0x13d   :  { %v48_v25 = vmul.f32 %v47_v23, %v47_v23 }
 0x13f   :  { %v49_v27 = vmul.f32 %v48_v25, %v41_v24 }
 0x141   :  { %v54_v28 = vmul.f32 %v91_v26, %v49_v27 }
 0x143   :  { %v56_v29 = vsel %vm55_vm3, %v54_v28, 0.0 }
 0x144   :  { %57 = vadd.xlane.f32.xlu1 %v56_v29 }
 0x1cd   :  { %v58_v30 = vpop.xlane.xlu1 %57 }
 0x1ce   :  { %v59_v31 = vrot.slane %v58_v30, 4 }
 0x1d0   :  { %v60_v32 = vadd.f32 %v59_v31, %v58_v30 }
 0x1d2   :  { %v61_v33 = vrot.slane %v60_v32, 2 }
 0x1d4   :  { %v62_v34 = vadd.f32 %v61_v33, %v60_v32 }
 0x1d6   :  { %v63_v35 = vrot.slane %v62_v34, 1 }
 0x1d8   :  { %v64_v36 = vadd.f32 %v63_v35, %v62_v34 }
 0x1da   :  { %92 = vpush %v64_v36 }
 0x20b   :  { %s93_s0 = spop %92 }
 0x20c   :  { %v66_v38 = vstv %s93_s0 }
 0x20d   :  { %v67_v39 = vadd.f32 %v66_v38, %v53_v37 }
 0x20f   :  { %69 = vst.msk [vmem:[#allocation2] sm:$0x1] %vm16_vm0, %v67_v39 }
 0x216   :  { %v73_v40 = vld [vmem:[#allocation2] sm:$0x1] }
 0x217   :  { %v74_v41 = vmul.f32 0.125, %v73_v40 }
 0x219   :  { %75 = vst.msk [vmem:[#allocation2] sm:$0x1] %vm16_vm0, %v74_v41 }
 0x21a   :  { %117 = shalt.err (!%p114_p4)
}
 0x21b   :  { %85 = dma.vmem_to_hbm [thread:$0]  %s83_s13, 16, %s160_s2, [#allocation3]  }
 0x21c   :  { %126 = dma.done.wait [#allocation3], 16  }
 0x21d   :  { %127 = vsyncadd [#allocation3], 4294967280 }
 0x21e   :  { %89 = vsyncpa [#allocation3], 1 }

</bundles_post_ra>
